<compile_context>
chip_gen: v7x
topology: tpu7x:2x2x1
jax: 0.10.0
libtpu: 0.0.40
codegen_flags: <defaults>
</compile_context>

<pallas_src>
import functools

import jax
import jax.numpy as jnp
from jax.experimental import pallas as pl
from jax.experimental.pallas import tpu as pltpu

EPS = 1e-5  # nn.GroupNorm default eps


def refine_head_kernel(x_ref, w1_ref, g_ref, b_ref, w2_ref, bias_ref, out_ref):
    # x_ref: (TM, D) bf16 row tile, channels on lanes.
    x = x_ref[...]

    # Linear(n_actor, n_actor, bias=False)  -> f32 accumulator on the MXU.
    h = jnp.dot(x, w1_ref[...], preferred_element_type=jnp.float32)   # (TM, D) f32

    # GroupNorm(num_groups=1, C) on (N, C): per-row normalize over channels.
    # Single-pass statistics: var = E[x^2] - mu^2 (one cross-lane reduce saved).
    mu = jnp.mean(h, axis=-1, keepdims=True)
    ms = jnp.mean(h * h, axis=-1, keepdims=True)
    var = ms - mu * mu
    h = (h - mu) * jax.lax.rsqrt(var + EPS) * g_ref[...] + b_ref[...]

    # ReLU
    h = jnp.maximum(h, 0.0)

    # nn.Linear(n_actor, out_dim) with bias; output padded to a multiple of 128
    # lanes so the store is unmasked / lane-dense.
    o = jnp.dot(h.astype(w2_ref.dtype), w2_ref[...],
                preferred_element_type=jnp.float32)                   # (TM, OUT_PAD)
    out_ref[...] = o + bias_ref[...]


def _round_up(x, m):
    return ((x + m - 1) // m) * m


@functools.partial(jax.jit, static_argnames=())
def refine_head(roi_feat, params):
    """roi_feat: (M, n_actor) f32.  Returns (M, 6, 30, 2) f32."""
    m, d = roi_feat.shape
    out_dim = params["w2"].shape[1]                 # 6 * 30 * 2 = 360
    out_pad = _round_up(out_dim, 128)               # 384 -> lane-dense output

    # Row tile: multiple of 8 sublanes; 128 rows for big inputs (fills MXU M).
    tm = 128 if m >= 128 else max(8, _round_up(m, 8))
    m_pad = _round_up(m, tm)

    # Host-side casts / zero-padding (padded rows are inert; sliced off below).
    x = roi_feat.astype(jnp.bfloat16)
    if m_pad != m:
        x = jnp.pad(x, ((0, m_pad - m), (0, 0)))
    w1 = params["w1"].astype(jnp.bfloat16)
    w2 = jnp.pad(params["w2"], ((0, 0), (0, out_pad - out_dim))).astype(jnp.bfloat16)
    b2 = jnp.pad(params["b2"], (0, out_pad - out_dim)).reshape(1, out_pad).astype(jnp.float32)
    gamma = params["gamma"].reshape(1, d).astype(jnp.float32)
    beta = params["beta"].reshape(1, d).astype(jnp.float32)

    grid = (m_pad // tm,)
    flops = 2 * m_pad * d * d + 2 * m_pad * d * out_pad
    bytes_accessed = int(x.size * 2 + w1.size * 2 + w2.size * 2 +
                         gamma.size * 4 + beta.size * 4 + b2.size * 4 +
                         m_pad * out_pad * 4)

    out = pl.pallas_call(
        refine_head_kernel,
        out_shape=jax.ShapeDtypeStruct((m_pad, out_pad), jnp.float32),
        grid_spec=pltpu.PrefetchScalarGridSpec(
            num_scalar_prefetch=0,
            grid=grid,
            in_specs=[
                pl.BlockSpec((tm, d), lambda i: (i, 0)),        # roi_feat row tile
                pl.BlockSpec((d, d), lambda i: (0, 0)),         # W1 (resident)
                pl.BlockSpec((1, d), lambda i: (0, 0)),         # GN gamma
                pl.BlockSpec((1, d), lambda i: (0, 0)),         # GN beta
                pl.BlockSpec((d, out_pad), lambda i: (0, 0)),   # W2 (resident)
                pl.BlockSpec((1, out_pad), lambda i: (0, 0)),   # bias
            ],
            out_specs=pl.BlockSpec((tm, out_pad), lambda i: (i, 0)),
        ),
        compiler_params=pltpu.CompilerParams(
            dimension_semantics=("parallel",),
            vmem_limit_bytes=64 << 20,
        ),
        cost_estimate=pl.CostEstimate(
            flops=flops, transcendentals=m_pad, bytes_accessed=bytes_accessed),
    )(x, w1, gamma, beta, w2, b2)

    out = out[:m, :out_dim]
    return out.reshape(-1, 6, 30, 2)


def refine_head_reference(roi_feat, params):
    """Plain-JAX f32 reference with the torch module's exact math."""
    hp = jax.lax.Precision.HIGHEST
    h = jnp.dot(roi_feat, params["w1"], precision=hp)
    mu = jnp.mean(h, axis=-1, keepdims=True)
    var = jnp.mean((h - mu) ** 2, axis=-1, keepdims=True)
    h = (h - mu) * jax.lax.rsqrt(var + EPS) * params["gamma"] + params["beta"]
    h = jnp.maximum(h, 0.0)
    o = jnp.dot(h, params["w2"], precision=hp) + params["b2"]
    return o.reshape(-1, 6, 30, 2)


if __name__ == "__main__":
    # config implied by the module
    config = {"num_mods": 6, "n_actor": 128}
    n_actor = config["n_actor"]
    out_dim = 6 * 30 * 2                    # 360
    n_roi = 48                              # e.g. 8 actors x 6 proposal modes

    key = jax.random.PRNGKey(0)
    k = jax.random.split(key, 6)

    roi_feat = jax.random.normal(k[0], (n_roi, n_actor), jnp.float32)

    # synthetic parameters; shapes follow __init__ (weights stored as (in, out))
    params = {
        "w1":    0.1 * jax.random.normal(k[1], (n_actor, n_actor), jnp.float32),
        "gamma": 1.0 + 0.1 * jax.random.normal(k[2], (n_actor,), jnp.float32),
        "beta":  0.1 * jax.random.normal(k[3], (n_actor,), jnp.float32),
        "w2":    0.1 * jax.random.normal(k[4], (n_actor, out_dim), jnp.float32),
        "b2":    0.1 * jax.random.normal(k[5], (out_dim,), jnp.float32),
    }

    out = jax.block_until_ready(refine_head(roi_feat, params))
    ref = jax.block_until_ready(refine_head_reference(roi_feat, params))

    assert out.shape == (n_roi, 6, 30, 2), out.shape
    err = float(jnp.max(jnp.abs(out - ref)))
    assert err < 5e-2, err

    print("KERNEL_OK")
</pallas_src>

<mosaic_0001>
module attributes {stable_mosaic.version = 11 : i64} {
  func.func @refine_head_kernel(%arg0: i32, %arg1: memref<48x128xbf16, #tpu.memory_space<vmem>>, %arg2: memref<128x128xbf16, #tpu.memory_space<vmem>>, %arg3: memref<1x128xf32, #tpu.memory_space<vmem>>, %arg4: memref<1x128xf32, #tpu.memory_space<vmem>>, %arg5: memref<128x384xbf16, #tpu.memory_space<vmem>>, %arg6: memref<1x384xf32, #tpu.memory_space<vmem>>, %arg7: memref<48x384xf32, #tpu.memory_space<vmem>>) attributes {dimension_semantics = [#tpu.dimension_semantics<parallel>], iteration_bounds = array<i64: 1>, scalar_prefetch = 0 : i64, scratch_operands = 0 : i64, tpu.core_type = #tpu.core_type<tc>, window_params = [{transform_indices = @transform_0, window_bounds = array<i64: 48, 128>}, {pipeline_mode = #tpu.pipeline_mode<synchronous>, transform_indices = @transform_1, window_bounds = array<i64: 128, 128>}, {pipeline_mode = #tpu.pipeline_mode<synchronous>, transform_indices = @transform_2, window_bounds = array<i64: 1, 128>}, {pipeline_mode = #tpu.pipeline_mode<synchronous>, transform_indices = @transform_3, window_bounds = array<i64: 1, 128>}, {pipeline_mode = #tpu.pipeline_mode<synchronous>, transform_indices = @transform_4, window_bounds = array<i64: 128, 384>}, {pipeline_mode = #tpu.pipeline_mode<synchronous>, transform_indices = @transform_5, window_bounds = array<i64: 1, 384>}, {transform_indices = @transform_6, window_bounds = array<i64: 48, 384>}]} {
    %c0 = arith.constant 0 : index
    %c0_0 = arith.constant 0 : index
    %0 = vector.load %arg1[%c0, %c0_0] : memref<48x128xbf16, #tpu.memory_space<vmem>>, vector<48x128xbf16>
    %c0_1 = arith.constant 0 : index
    %c0_2 = arith.constant 0 : index
    %1 = vector.load %arg2[%c0_1, %c0_2] : memref<128x128xbf16, #tpu.memory_space<vmem>>, vector<128x128xbf16>
    %cst = arith.constant dense<0.000000e+00> : vector<48x128xf32>
    %2 = tpu.matmul %0, %1, %cst {dimension_numbers = #tpu.dot_dimension_numbers<[1], [0], [0], [1], [0, 0, 1, 1], [], []>} : vector<48x128xbf16>, vector<128x128xbf16>, vector<48x128xf32> -> vector<48x128xf32>
    %cst_3 = arith.constant dense<0.000000e+00> : vector<48xf32>
    %3 = vector.multi_reduction <add>, %2, %cst_3 [1] : vector<48x128xf32> to vector<48xf32>
    %4 = vector.shape_cast %3 : vector<48xf32> to vector<48x1xf32>
    %cst_4 = arith.constant 1.280000e+02 : f32
    %5 = vector.broadcast %cst_4 : f32 to vector<48x1xf32>
    %6 = arith.divf %4, %5 : vector<48x1xf32>
    %7 = arith.mulf %2, %2 : vector<48x128xf32>
    %cst_5 = arith.constant dense<0.000000e+00> : vector<48xf32>
    %8 = vector.multi_reduction <add>, %7, %cst_5 [1] : vector<48x128xf32> to vector<48xf32>
    %9 = vector.shape_cast %8 : vector<48xf32> to vector<48x1xf32>
    %cst_6 = arith.constant 1.280000e+02 : f32
    %10 = vector.broadcast %cst_6 : f32 to vector<48x1xf32>
    %11 = arith.divf %9, %10 : vector<48x1xf32>
    %12 = arith.mulf %6, %6 : vector<48x1xf32>
    %13 = arith.subf %11, %12 : vector<48x1xf32>
    %14 = vector.broadcast %6 : vector<48x1xf32> to vector<48x128xf32>
    %15 = arith.subf %2, %14 : vector<48x128xf32>
    %cst_7 = arith.constant 9.99999974E-6 : f32
    %16 = vector.broadcast %cst_7 : f32 to vector<48x1xf32>
    %17 = arith.addf %13, %16 : vector<48x1xf32>
    %18 = math.rsqrt %17 : vector<48x1xf32>
    %19 = vector.broadcast %18 : vector<48x1xf32> to vector<48x128xf32>
    %20 = arith.mulf %15, %19 : vector<48x128xf32>
    %c0_8 = arith.constant 0 : index
    %c0_9 = arith.constant 0 : index
    %21 = vector.load %arg3[%c0_8, %c0_9] : memref<1x128xf32, #tpu.memory_space<vmem>>, vector<1x128xf32>
    %22 = vector.broadcast %21 : vector<1x128xf32> to vector<48x128xf32>
    %23 = arith.mulf %20, %22 : vector<48x128xf32>
    %c0_10 = arith.constant 0 : index
    %c0_11 = arith.constant 0 : index
    %24 = vector.load %arg4[%c0_10, %c0_11] : memref<1x128xf32, #tpu.memory_space<vmem>>, vector<1x128xf32>
    %25 = vector.broadcast %24 : vector<1x128xf32> to vector<48x128xf32>
    %26 = arith.addf %23, %25 : vector<48x128xf32>
    %cst_12 = arith.constant 0.000000e+00 : f32
    %27 = vector.broadcast %cst_12 : f32 to vector<48x128xf32>
    %28 = arith.maximumf %26, %27 : vector<48x128xf32>
    %29 = arith.truncf %28 : vector<48x128xf32> to vector<48x128xbf16>
    %c0_13 = arith.constant 0 : index
    %c0_14 = arith.constant 0 : index
    %30 = vector.load %arg5[%c0_13, %c0_14] : memref<128x384xbf16, #tpu.memory_space<vmem>>, vector<128x384xbf16>
    %cst_15 = arith.constant dense<0.000000e+00> : vector<48x384xf32>
    %31 = tpu.matmul %29, %30, %cst_15 {dimension_numbers = #tpu.dot_dimension_numbers<[1], [0], [0], [1], [0, 0, 1, 1], [], []>} : vector<48x128xbf16>, vector<128x384xbf16>, vector<48x384xf32> -> vector<48x384xf32>
    %c0_16 = arith.constant 0 : index
    %c0_17 = arith.constant 0 : index
    %32 = vector.load %arg6[%c0_16, %c0_17] : memref<1x384xf32, #tpu.memory_space<vmem>>, vector<1x384xf32>
    %33 = vector.broadcast %32 : vector<1x384xf32> to vector<48x384xf32>
    %34 = arith.addf %31, %33 : vector<48x384xf32>
    %c0_18 = arith.constant 0 : index
    %c0_19 = arith.constant 0 : index
    %35 = vector.load %arg7[%c0_18, %c0_19] : memref<48x384xf32, #tpu.memory_space<vmem>>, vector<48x384xf32>
    tpu.vector_store %arg7[%c0_18, %c0_19], %34 {strides = array<i32>} : memref<48x384xf32, #tpu.memory_space<vmem>>, vector<48x384xf32>,
    return
  }
  func.func @transform_0(%arg0: i32) -> (i32, i32) {
    %c0_i32 = arith.constant 0 : i32
    %c0_i32_0 = arith.constant 0 : i32
    return %arg0, %c0_i32 : i32, i32
  }
  func.func @transform_1(%arg0: i32) -> (i32, i32) {
    %c0_i32 = arith.constant 0 : i32
    %c0_i32_0 = arith.constant 0 : i32
    %c0_i32_1 = arith.constant 0 : i32
    return %c0_i32, %c0_i32_0 : i32, i32
  }
  func.func @transform_2(%arg0: i32) -> (i32, i32) {
    %c0_i32 = arith.constant 0 : i32
    %c0_i32_0 = arith.constant 0 : i32
    %c0_i32_1 = arith.constant 0 : i32
    return %c0_i32, %c0_i32_0 : i32, i32
  }
  func.func @transform_3(%arg0: i32) -> (i32, i32) {
    %c0_i32 = arith.constant 0 : i32
    %c0_i32_0 = arith.constant 0 : i32
    %c0_i32_1 = arith.constant 0 : i32
    return %c0_i32, %c0_i32_0 : i32, i32
  }
  func.func @transform_4(%arg0: i32) -> (i32, i32) {
    %c0_i32 = arith.constant 0 : i32
    %c0_i32_0 = arith.constant 0 : i32
    %c0_i32_1 = arith.constant 0 : i32
    return %c0_i32, %c0_i32_0 : i32, i32
  }
  func.func @transform_5(%arg0: i32) -> (i32, i32) {
    %c0_i32 = arith.constant 0 : i32
    %c0_i32_0 = arith.constant 0 : i32
    %c0_i32_1 = arith.constant 0 : i32
    return %c0_i32, %c0_i32_0 : i32, i32
  }
  func.func @transform_6(%arg0: i32) -> (i32, i32) {
    %c0_i32 = arith.constant 0 : i32
    %c0_i32_0 = arith.constant 0 : i32
    return %arg0, %c0_i32 : i32, i32
  }
}

</mosaic_0001>

<bundles_post_ra>
// kernel: refine_head.1
= control target key start
LH: loop header
LB: loop body
LE: loop exit
PB: predicated region body
PF: predicated region fallthrough
CT: control target
= control target key end

     0   :  { %11 = vsyncpa [#allocation3], 0  ;;  %s1317_s0 = inlined_call_operand.hbm [shape: bf16[48,128], index: 0, kind: input, shape index: {}]   ;;  %s1318_s1 = inlined_call_operand.hbm [shape: bf16[128,128], index: 1, kind: input, shape index: {}]   ;;  %s1319_s2 = inlined_call_operand.hbm [shape: f32[1,128], index: 2, kind: input, shape index: {}]   ;;  %s1320_s3 = inlined_call_operand.hbm [shape: f32[1,128], index: 3, kind: input, shape index: {}]   ;;  %s1321_s4 = inlined_call_operand.hbm [shape: bf16[128,384], index: 4, kind: input, shape index: {}]   ;;  %s1322_s5 = inlined_call_operand.hbm [shape: f32[1,384], index: 5, kind: input, shape index: {}]   ;;  %s1323_s6 = inlined_call_operand.hbm [shape: f32[48,384], index: 6, kind: output, shape index: {}]  }
   0x1   :  { %12 = vsyncpa [#allocation6], 0 }
   0x2   :  { %13 = vsyncpa [#allocation9], 0 }
   0x3   :  { %14 = vsyncpa [#allocation12], 0 }
   0x4   :  { %15 = vsyncpa [#allocation4], 0  ;;  %s1061_s21 = smov [#allocation5]   ;;  %s1062_s23 = smov [#allocation8]  }
   0x5   :  { %s33_s22 = sshll.u32 %s1061_s21, 4  ;;  %s56_s24 = sshll.u32 %s1062_s23, 4  ;;  %s34_s22 = int_to_ptr.vmem [resolvable:$true] %s33_s22  ;;  %s1112_s24 = int_to_ptr.vmem [resolvable:$true] %s56_s24 }
   0x6   :  { %s897_s27 = scalar_lea.hbm %s1318_s1, 1024 }
   0x7   :  { %p898_p0 = scmp.ne.s32.totalorder %s1318_s1, %s897_s27  ;;  %p901_p1 = scmp.lt.u32.totalorder %s897_s27, %s1318_s1 }
   0x9   :  { %p903_p2 = pnand %p901_p1, %p898_p0 }
   0xb   :  { %906 = shalt.err (!%p903_p2)
}
   0xc   :  { %s907_s8 = scalar_lea.vmem %s34_s22, 1024  ;;  %p912_p4 = scmp.lt.s32.totalorder %s34_s22, %s34_s22 }
   0xd   :  { %p908_p3 = scmp.ne.s32.totalorder %s34_s22, %s907_s8  ;;  %p913_p5 = scmp.lt.s32.totalorder %s907_s8, %s907_s8 }
   0xf   :  { %p914_p6 = por %p913_p5, %p912_p4 }
  0x11   :  { %p915_p7 = pnand %p914_p6, %p908_p3 }
  0x13   :  { %918 = shalt.err (!%p915_p7)
}
  0x14   :  { %s1063_s9 = smov 64   ;;  %s1064_s10 = smov 4  }
  0x15   :  { %39 = dma.hbm_to_vmem [thread:$0]  %s1318_s1, 1024, %s34_s22, [#allocation6], %s1063_s9, %s1063_s9, %s1064_s10  }
  0x16   :  { %s919_s15 = scalar_lea.hbm %s1320_s3, 16 }
  0x17   :  { %p920_p8 = scmp.ne.s32.totalorder %s1320_s3, %s919_s15  ;;  %p923_p9 = scmp.lt.u32.totalorder %s919_s15, %s1320_s3 }
  0x19   :  { %p925_p10 = pnand %p923_p9, %p920_p8 }
  0x1b   :  { %928 = shalt.err (!%p925_p10)
}
  0x1c   :  { %s929_s20 = scalar_lea.vmem %s1112_s24, 16  ;;  %s933_s1 = scalar_lea.vmem %s1112_s24, 32 }
  0x1d   :  { %p930_p11 = scmp.ne.s32.totalorder %s1112_s24, %s929_s20  ;;  %p934_p12 = scmp.lt.s32.totalorder %s1112_s24, %s1112_s24 }
  0x1e   :  { %p935_p13 = scmp.lt.s32.totalorder %s933_s1, %s929_s20 }
  0x20   :  { %p936_p0 = por %p935_p13, %p934_p12 }
  0x22   :  { %p937_p1 = pnand %p936_p0, %p930_p11 }
  0x24   :  { %940 = shalt.err (!%p937_p1)
}
  0x25   :  { %59 = dma.hbm_to_vmem [thread:$0]  %s1320_s3, 16, %s1112_s24, [#allocation9]  }
  0x26   :  { %s1065_s23 = smov [#allocation2]   ;;  %s1066_s26 = smov [#allocation7]  }
  0x27   :  { %s21_s25 = sshll.u32 %s1065_s23, 4  ;;  %s46_s27 = sshll.u32 %s1066_s26, 4  ;;  %s22_s25 = int_to_ptr.vmem [resolvable:$true] %s21_s25  ;;  %s47_s27 = int_to_ptr.vmem [resolvable:$true] %s46_s27 }
  0x28   :  { %s941_s30 = scalar_lea.hbm %s1317_s0, 384 }
  0x29   :  { %p942_p2 = scmp.ne.s32.totalorder %s1317_s0, %s941_s30  ;;  %p945_p3 = scmp.lt.u32.totalorder %s941_s30, %s1317_s0 }
  0x2b   :  { %p947_p4 = pnand %p945_p3, %p942_p2 }
  0x2d   :  { %950 = shalt.err (!%p947_p4)
}
  0x2e   :  { %s951_s3 = scalar_lea.vmem %s22_s25, 384  ;;  %p956_p6 = scmp.lt.s32.totalorder %s22_s25, %s22_s25 }
  0x2f   :  { %p952_p5 = scmp.ne.s32.totalorder %s22_s25, %s951_s3  ;;  %p957_p7 = scmp.lt.s32.totalorder %s951_s3, %s951_s3 }
  0x31   :  { %p958_p8 = por %p957_p7, %p956_p6 }
  0x33   :  { %p959_p9 = pnand %p958_p8, %p952_p5 }
  0x35   :  { %962 = shalt.err (!%p959_p9)
}
  0x36   :  { %27 = dma.hbm_to_vmem [thread:$0]  %s1317_s0, 384, %s22_s25, [#allocation3], %s1063_s9, %s1063_s9, %s1064_s10  }
  0x37   :  { %s963_s16 = scalar_lea.hbm %s1319_s2, 16 }
  0x38   :  { %p964_p10 = scmp.ne.s32.totalorder %s1319_s2, %s963_s16  ;;  %p967_p11 = scmp.lt.u32.totalorder %s963_s16, %s1319_s2 }
  0x3a   :  { %p969_p12 = pnand %p967_p11, %p964_p10 }
  0x3c   :  { %972 = shalt.err (!%p969_p12)
}
  0x3d   :  { %s973_s1 = scalar_lea.vmem %s47_s27, 16  ;;  %s977_s21 = scalar_lea.vmem %s47_s27, 32 }
  0x3e   :  { %p974_p13 = scmp.ne.s32.totalorder %s47_s27, %s973_s1  ;;  %p978_p0 = scmp.lt.s32.totalorder %s47_s27, %s47_s27 }
  0x3f   :  { %p979_p1 = scmp.lt.s32.totalorder %s977_s21, %s973_s1 }
  0x41   :  { %p980_p2 = por %p979_p1, %p978_p0 }
  0x43   :  { %p981_p3 = pnand %p980_p2, %p974_p13 }
  0x45   :  { %984 = shalt.err (!%p981_p3)
}
  0x46   :  { %49 = dma.hbm_to_vmem [thread:$0]  %s1319_s2, 16, %s47_s27, [#allocation6]  }
  0x47   :  { %s1067_s10 = smov [#allocation10]   ;;  %s985_s26 = scalar_lea.hbm %s1321_s4, 3072 }
  0x48   :  { %s65_s22 = sshll.u32 %s1067_s10, 4  ;;  %p986_p4 = scmp.ne.s32.totalorder %s1321_s4, %s985_s26  ;;  %s66_s22 = int_to_ptr.vmem [resolvable:$true] %s65_s22 }
  0x49   :  { %p989_p5 = scmp.lt.u32.totalorder %s985_s26, %s1321_s4 }
  0x4b   :  { %p991_p6 = pnand %p989_p5, %p986_p4 }
  0x4d   :  { %994 = shalt.err (!%p991_p6)
}
  0x4e   :  { %s995_s8 = scalar_lea.vmem %s66_s22, 3072  ;;  %p1000_p8 = scmp.lt.s32.totalorder %s66_s22, %s66_s22 }
  0x4f   :  { %p996_p7 = scmp.ne.s32.totalorder %s66_s22, %s995_s8  ;;  %p1001_p9 = scmp.lt.s32.totalorder %s995_s8, %s995_s8 }
  0x51   :  { %p1002_p10 = por %p1001_p9, %p1000_p8 }
  0x53   :  { %p1003_p11 = pnand %p1002_p10, %p996_p7 }
  0x55   :  { %1006 = shalt.err (!%p1003_p11)
}
  0x56   :  { %s1068_s2 = smov 192   ;;  %s1069_s27 = smov 12  }
  0x57   :  { %71 = dma.hbm_to_vmem [thread:$0]  %s1321_s4, 3072, %s66_s22, [#allocation9], %s1068_s2, %s1068_s2, %s1069_s27  }
  0x58   :  { %s1070_s3 = smov [#allocation11]   ;;  %s1007_s15 = scalar_lea.hbm %s1322_s5, 48 }
  0x59   :  { %s78_s24 = sshll.u32 %s1070_s3, 4  ;;  %p1008_p12 = scmp.ne.s32.totalorder %s1322_s5, %s1007_s15  ;;  %s79_s24 = int_to_ptr.vmem [resolvable:$true] %s78_s24 }
  0x5a   :  { %p1011_p13 = scmp.lt.u32.totalorder %s1007_s15, %s1322_s5 }
  0x5c   :  { %p1013_p0 = pnand %p1011_p13, %p1008_p12 }
  0x5e   :  { %1016 = shalt.err (!%p1013_p0)
}
  0x5f   :  { %s1017_s20 = scalar_lea.vmem %s79_s24, 48  ;;  %s1021_s4 = scalar_lea.vmem %s79_s24, 64 }
  0x60   :  { %p1018_p1 = scmp.ne.s32.totalorder %s79_s24, %s1017_s20  ;;  %p1022_p2 = scmp.lt.s32.totalorder %s79_s24, %s79_s24 }
  0x61   :  { %p1023_p3 = scmp.lt.s32.totalorder %s1021_s4, %s1017_s20 }
  0x63   :  { %p1024_p4 = por %p1023_p3, %p1022_p2 }
  0x65   :  { %p1025_p5 = pnand %p1024_p4, %p1018_p1 }
  0x67   :  { %1028 = shalt.err (!%p1025_p5)
}
  0x68   :  { %81 = dma.hbm_to_vmem [thread:$0]  %s1322_s5, 48, %s79_s24, [#allocation12]  }
  0x69   :  { %1051 = dma.done.wait [#allocation3], 384  }
  0x6a   :  { %1052 = vsyncadd [#allocation3], 4294966912 }
  0x6b   :  { %1053 = dma.done.wait [#allocation6], 1040  }
  0x6c   :  { %1054 = vsyncadd [#allocation6], 4294966256 }
  0x6d   :  { %1055 = dma.done.wait [#allocation9], 3088  }
  0x6e   :  { %1056 = vsyncadd [#allocation9], 4294964208 }
  0x6f   :  { %1057 = dma.done.wait [#allocation12], 48  }
  0x70   :  { %1058 = vsyncadd [#allocation12], 4294967248  ;;  %v1071_v0 = vmov 0.0   ;;  %vm1072_vm0 = vmmov 0   ;;  %v842_v1 = vld [vmem:[#allocation5] sm:$0xff]   ;;  %v843_v2 = vld [vmem:[#allocation5 + $0x8] sm:$0xff]  }
  0x71   :  { %754 = vmatprep.subr.bf16.mxu0 %v1071_v0  ;;  %770 = vmatprep.mubr.msk.bf16.mxu0 %vm1072_vm0, %v1071_v0  ;;  %v844_v3 = vld [vmem:[#allocation5 + $0x10] sm:$0xff]   ;;  %v845_v4 = vld [vmem:[#allocation5 + $0x18] sm:$0xff]   ;;  %v846_v5 = vld [vmem:[#allocation5 + $0x20] sm:$0xff]   ;;  %v1073_v54 = vmov 0   ;;  %s1074_s5 = smov [#allocation13]  }
  0x72   :  { %755 = vmatpush3.bf16.msra.mxu0 %v842_v1  ;;  %v847_v6 = vld [vmem:[#allocation5 + $0x28] sm:$0xff]   ;;  %v848_v7 = vld [vmem:[#allocation5 + $0x30] sm:$0xff]   ;;  %v849_v8 = vld [vmem:[#allocation5 + $0x38] sm:$0xff]   ;;  %569 = vmatprep.mubr.bf16.mxu1 %v1073_v54  ;;  %s680_s0 = sshll.u32 %s1074_s5, 4  ;;  %s681_s0 = int_to_ptr.vmem [resolvable:$true] %s680_s0 }
  0x73   :  { %756 = vmatprep.subr.bf16.mxu0 %v1071_v0  ;;  %v850_v9 = vld [vmem:[#allocation2] sm:$0xff]   ;;  %v851_v10 = vld [vmem:[#allocation2 + $0x8] sm:$0xff]   ;;  %v852_v11 = vld [vmem:[#allocation2 + $0x10] sm:$0xff]   ;;  %s1029_s9 = scalar_lea.vmem %s681_s0, 2304  ;;  %p1034_p7 = scmp.lt.s32.totalorder %s681_s0, %s681_s0 }
  0x74   :  { %v853_v24 = vld [vmem:[#allocation10 + $0x4] ss:$12 sps:$4 sm:$0xff]   ;;  %v855_v25 = vld [vmem:[#allocation10] ss:$12 sps:$4 sm:$0xff]   ;;  %v1235_v26 = vld [vmem:[#allocation10 + $0x8] ss:$12 sps:$4 sm:$0xff]   ;;  %p1030_p6 = scmp.ne.s32.totalorder %s681_s0, %s1029_s9  ;;  %p1035_p8 = scmp.lt.s32.totalorder %s1029_s9, %s1029_s9 }
  0x75   :  { %537 = vmatprep.subr.bf16.mxu1 %v853_v24  ;;  %v857_v30 = vld [vmem:[#allocation10 + $0x1c] ss:$12 sps:$4 sm:$0xff]   ;;  %v859_v32 = vld [vmem:[#allocation10 + $0x18] ss:$12 sps:$4 sm:$0xff]   ;;  %v1249_v35 = vld [vmem:[#allocation10 + $0x20] ss:$12 sps:$4 sm:$0xff]  }
  0x76   :  { %757 = vmatpush3.bf16.msra.mxu0 %v843_v2  ;;  %538 = vmatpush1.bf16.msra.mxu1 %v855_v25  ;;  %v861_v36 = vld [vmem:[#allocation10 + $0x34] ss:$12 sps:$4 sm:$0xff]   ;;  %v863_v37 = vld [vmem:[#allocation10 + $0x30] ss:$12 sps:$4 sm:$0xff]   ;;  %v1253_v38 = vld [vmem:[#allocation10 + $0x38] ss:$12 sps:$4 sm:$0xff]   ;;  %p1036_p9 = por %p1035_p8, %p1034_p7 }
  0x77   :  { %758 = vmatprep.subr.bf16.mxu0 %v1071_v0  ;;  %539 = vmatprep.subr.bf16.mxu1 %v857_v30  ;;  %v865_v39 = vld [vmem:[#allocation10 + $0x4c] ss:$12 sps:$4 sm:$0xff]   ;;  %v867_v40 = vld [vmem:[#allocation10 + $0x48] ss:$12 sps:$4 sm:$0xff]   ;;  %v1257_v41 = vld [vmem:[#allocation10 + $0x50] ss:$12 sps:$4 sm:$0xff]  }
  0x78   :  { %v869_v42 = vld [vmem:[#allocation10 + $0x64] ss:$12 sps:$4 sm:$0xff]   ;;  %v871_v43 = vld [vmem:[#allocation10 + $0x60] ss:$12 sps:$4 sm:$0xff]   ;;  %v1261_v44 = vld [vmem:[#allocation10 + $0x68] ss:$12 sps:$4 sm:$0xff]   ;;  %p1037_p10 = pnand %p1036_p9, %p1030_p6 }
  0x79   :  { %v873_v45 = vld [vmem:[#allocation10 + $0x7c] ss:$12 sps:$4 sm:$0xff]   ;;  %v875_v46 = vld [vmem:[#allocation10 + $0x78] ss:$12 sps:$4 sm:$0xff]   ;;  %v1265_v47 = vld [vmem:[#allocation10 + $0x80] ss:$12 sps:$4 sm:$0xff]  }
  0x7a   :  { %759 = vmatpush3.bf16.msra.mxu0 %v844_v3  ;;  %540 = vmatpush1.bf16.msra.mxu1 %v859_v32  ;;  %v877_v48 = vld [vmem:[#allocation10 + $0x94] ss:$12 sps:$4 sm:$0xff]   ;;  %v879_v49 = vld [vmem:[#allocation10 + $0x90] ss:$12 sps:$4 sm:$0xff]   ;;  %v1269_v50 = vld [vmem:[#allocation10 + $0x98] ss:$12 sps:$4 sm:$0xff]  }
  0x7b   :  { %760 = vmatprep.subr.bf16.mxu0 %v1071_v0  ;;  %541 = vmatprep.subr.bf16.mxu1 %v861_v36  ;;  %v881_v51 = vld [vmem:[#allocation10 + $0xac] ss:$12 sps:$4 sm:$0xff]   ;;  %v883_v52 = vld [vmem:[#allocation10 + $0xa8] ss:$12 sps:$4 sm:$0xff]   ;;  %v1273_v53 = vld [vmem:[#allocation10 + $0xb0] ss:$12 sps:$4 sm:$0xff]  }
  0x7e   :  { %761 = vmatpush3.bf16.msra.mxu0 %v845_v4  ;;  %542 = vmatpush1.bf16.msra.mxu1 %v863_v37 }
  0x7f   :  { %762 = vmatprep.subr.bf16.mxu0 %v1071_v0  ;;  %543 = vmatprep.subr.bf16.mxu1 %v865_v39 }
  0x82   :  { %763 = vmatpush3.bf16.msra.mxu0 %v846_v5  ;;  %544 = vmatpush1.bf16.msra.mxu1 %v867_v40 }
  0x83   :  { %764 = vmatprep.subr.bf16.mxu0 %v1071_v0  ;;  %545 = vmatprep.subr.bf16.mxu1 %v869_v42 }
  0x86   :  { %765 = vmatpush3.bf16.msra.mxu0 %v847_v6  ;;  %546 = vmatpush1.bf16.msra.mxu1 %v871_v43 }
  0x87   :  { %766 = vmatprep.subr.bf16.mxu0 %v1071_v0  ;;  %547 = vmatprep.subr.bf16.mxu1 %v873_v45 }
  0x8a   :  { %767 = vmatpush3.bf16.msra.mxu0 %v848_v7  ;;  %548 = vmatpush1.bf16.msra.mxu1 %v875_v46 }
  0x8b   :  { %768 = vmatprep.subr.bf16.mxu0 %v1071_v0  ;;  %549 = vmatprep.subr.bf16.mxu1 %v877_v48 }
  0x8e   :  { %769 = vmatpush3.bf16.msra.mxu0 %v849_v8  ;;  %550 = vmatpush1.bf16.msra.mxu1 %v879_v49 }
  0x8f   :  { %782 = vmatprep.subr.bf16.mxu0 %v1071_v0  ;;  %551 = vmatprep.subr.bf16.mxu1 %v881_v51 }
  0x91   :  { %771 = vmatmul.mubr.bf16.vlgmr.msra.gmra.mrb[0].mxu0 %v850_v9 }
  0x92   :  { %774 = vmatprep.mubr.msk.bf16.mxu0 %vm1072_vm0, %v1071_v0  ;;  %783 = vmatpush3.bf16.msra.mxu0 %v1235_v26 }
  0x93   :  { %784 = vmatprep.subr.bf16.mxu0 %v1071_v0  ;;  %552 = vmatpush1.bf16.msra.mxu1 %v883_v52 }
  0x94   :  { %810 = vmatprep.subr.bf16.mxu1 %v1071_v0 }
  0x96   :  { %785 = vmatpush3.bf16.msra.mxu0 %v1249_v35 }
  0x97   :  { %786 = vmatprep.subr.bf16.mxu0 %v1071_v0 }
  0x99   :  { %775 = vmatmul.mubr.bf16.gmra.mrb[4].mxu0 %v851_v10 }
  0x9a   :  { %778 = vmatprep.mubr.msk.bf16.mxu0 %vm1072_vm0, %v1071_v0  ;;  %787 = vmatpush3.bf16.msra.mxu0 %v1253_v38 }
  0x9b   :  { %788 = vmatprep.subr.bf16.mxu0 %v1071_v0 }
  0x9e   :  { %789 = vmatpush3.bf16.msra.mxu0 %v1257_v41 }
  0x9f   :  { %790 = vmatprep.subr.bf16.mxu0 %v1071_v0 }
  0xa1   :  { %779 = vmatmul.mubr.bf16.gmra.mrb[8].mxu0 %v852_v11 }
  0xa2   :  { %798 = vmatprep.mubr.msk.bf16.mxu0 %vm1072_vm0, %v1071_v0  ;;  %791 = vmatpush3.bf16.msra.mxu0 %v1261_v44 }
  0xa3   :  { %792 = vmatprep.subr.bf16.mxu0 %v1071_v0 }
  0xa6   :  { %793 = vmatpush3.bf16.msra.mxu0 %v1265_v47 }
  0xa7   :  { %794 = vmatprep.subr.bf16.mxu0 %v1071_v0 }
  0xaa   :  { %795 = vmatpush3.bf16.msra.mxu0 %v1269_v50 }
  0xab   :  { %796 = vmatprep.subr.bf16.mxu0 %v1071_v0 }
  0xae   :  { %797 = vmatpush3.bf16.msra.mxu0 %v1273_v53 }
 0x164   :  { %v1215_v12 = vpop.f32.mrb[0].mxu0 }
 0x165   :  { %246 = vadd.xlane.f32.xlu0 %v1215_v12  ;;  %v772_v13 = vpop.f32.mrb[1].mxu0  ;;  %v265_v14 = vmul.f32 %v1215_v12, %v1215_v12 }
 0x166   :  { %v1220_v15 = vpop.f32.mrb[2].mxu0 }
 0x167   :  { %271 = vadd.xlane.f32.xlu1 %v265_v14  ;;  %v773_v16 = vpop.f32.mrb[3].mxu0  ;;  %v266_v17 = vmul.f32 %v1220_v15, %v1220_v15 }
 0x169   :  { %248 = vadd.xlane.f32.xlu0 %v1220_v15 }
 0x16b   :  { %273 = vadd.xlane.f32.xlu1 %v266_v17 }
 0x16c   :  { %v1225_v18 = vpop.f32.mrb[4].mxu0 }
 0x16d   :  { %250 = vadd.xlane.f32.xlu0 %v1225_v18  ;;  %v776_v19 = vpop.f32.mrb[5].mxu0  ;;  %v267_v20 = vmul.f32 %v1225_v18, %v1225_v18 }
 0x16e   :  { %v1230_v21 = vpop.f32.mrb[6].mxu0 }
 0x16f   :  { %252 = vadd.xlane.f32.xlu1 %v1230_v21  ;;  %v268_v22 = vmul.f32 %v1230_v21, %v1230_v21  ;;  %v777_v23 = vpop.f32.mrb[7].mxu0 }
 0x171   :  { %275 = vadd.xlane.f32.xlu0 %v267_v20 }
 0x173   :  { %277 = vadd.xlane.f32.xlu1 %v268_v22 }
 0x174   :  { %v1237_v27 = vpop.f32.mrb[8].mxu0 }
 0x175   :  { %254 = vadd.xlane.f32.xlu0 %v1237_v27  ;;  %v780_v28 = vpop.f32.mrb[9].mxu0  ;;  %v269_v29 = vmul.f32 %v1237_v27, %v1237_v27 }
 0x176   :  { %v1243_v31 = vpop.f32.mrb[10].mxu0 }
 0x177   :  { %256 = vadd.xlane.f32.xlu1 %v1243_v31  ;;  %v270_v33 = vmul.f32 %v1243_v31, %v1243_v31  ;;  %v781_v34 = vpop.f32.mrb[11].mxu0 }
 0x179   :  { %279 = vadd.xlane.f32.xlu0 %v269_v29 }
 0x17b   :  { %281 = vadd.xlane.f32.xlu1 %v270_v33  ;;  %v706_v33 = vld [vmem:[#allocation7] ss:$0 sm:$0xff] }
 0x1f2   :  { %v247_v55 = vpop.xlane.xlu0 %246 }
 0x1f3   :  { %v259_v56 = vmul.f32 0.0078125, %v247_v55 }
 0x1f4   :  { %v272_v57 = vpop.xlane.xlu1 %271 }
 0x1f5   :  { %v289_v58 = vmul.f32 %v259_v56, %v259_v56  ;;  %v283_v59 = vmul.f32 0.0078125, %v272_v57  ;;  %v301_v25 = vsub.f32 %v1215_v12, %v259_v56  ;;  %v707_v12 = vld [vmem:[#allocation8] ss:$0 sm:$0xff] }
 0x1f6   :  { %v249_v60 = vpop.xlane.xlu0 %248 }
 0x1f7   :  { %v295_v61 = vsub.f32 %v283_v59, %v289_v58  ;;  %v260_v62 = vmul.f32 0.0078125, %v249_v60 }
 0x1f8   :  { %v274_v63 = vpop.xlane.xlu1 %273 }
 0x1f9   :  { %v307_v1 = vadd.f32 1e-05, %v295_v61  ;;  %v290_v2 = vmul.f32 %v260_v62, %v260_v62  ;;  %v284_v3 = vmul.f32 0.0078125, %v274_v63  ;;  %v302_v40 = vsub.f32 %v1220_v15, %v260_v62 }
 0x1fa   :  { %v251_v4 = vpop.xlane.xlu0 %250 }
 0x1fb   :  { %885 = vrsqrt.f32 %v307_v1  ;;  %v296_v5 = vsub.f32 %v284_v3, %v290_v2  ;;  %v261_v6 = vmul.f32 0.0078125, %v251_v4 }
 0x1fc   :  { %v253_v7 = vpop.xlane.xlu1 %252 }
 0x1fd   :  { %v308_v8 = vadd.f32 1e-05, %v296_v5  ;;  %v291_v9 = vmul.f32 %v261_v6, %v261_v6  ;;  %v262_v10 = vmul.f32 0.0078125, %v253_v7  ;;  %v303_v59 = vsub.f32 %v1225_v18, %v261_v6 }
 0x1fe   :  { %v276_v11 = vpop.xlane.xlu0 %275 }
 0x1ff   :  { %887 = vrsqrt.f32 %v308_v8  ;;  %v292_v13 = vmul.f32 %v262_v10, %v262_v10  ;;  %v285_v14 = vmul.f32 0.0078125, %v276_v11  ;;  %v304_v15 = vsub.f32 %v1230_v21, %v262_v10 }
 0x200   :  { %v278_v16 = vpop.xlane.xlu1 %277 }
 0x201   :  { %v297_v17 = vsub.f32 %v285_v14, %v291_v9  ;;  %v286_v19 = vmul.f32 0.0078125, %v278_v16 }
 0x202   :  { %v255_v20 = vpop.xlane.xlu0 %254 }
 0x203   :  { %v309_v22 = vadd.f32 1e-05, %v297_v17  ;;  %v298_v23 = vsub.f32 %v286_v19, %v292_v13  ;;  %v263_v24 = vmul.f32 0.0078125, %v255_v20 }
 0x204   :  { %v257_v28 = vpop.xlane.xlu1 %256 }
 0x205   :  { %v886_v29 = vpop.eup %885  ;;  %889 = vrsqrt.f32 %v309_v22  ;;  %v310_v30 = vadd.f32 1e-05, %v298_v23  ;;  %v293_v32 = vmul.f32 %v263_v24, %v263_v24  ;;  %v264_v34 = vmul.f32 0.0078125, %v257_v28  ;;  %v392_v23 = vld [vmem:[#allocation11] sm:$0x7] }
 0x206   :  { %v280_v36 = vpop.xlane.xlu0 %279  ;;  %v319_v37 = vmul.f32 %v886_v29, %v301_v25  ;;  %v305_v18 = vsub.f32 %v1237_v27, %v263_v24 }
 0x207   :  { %891 = vrsqrt.f32 %v310_v30  ;;  %v287_v39 = vmul.f32 0.0078125, %v280_v36  ;;  %v294_v42 = vmul.f32 %v264_v34, %v264_v34  ;;  %v306_v9 = vsub.f32 %v1243_v31, %v264_v34 }
 0x208   :  { %v282_v43 = vpop.xlane.xlu1 %281  ;;  %v332_v45 = vmul.f32 %v706_v33, %v319_v37 }
 0x209   :  { %v888_v46 = vpop.eup %887  ;;  %v299_v48 = vsub.f32 %v287_v39, %v293_v32  ;;  %v288_v49 = vmul.f32 0.0078125, %v282_v43 }
 0x20a   :  { %v320_v51 = vmul.f32 %v888_v46, %v302_v40  ;;  %v345_v57 = vadd.f32 %v707_v12, %v332_v45 }
 0x20b   :  { %v311_v52 = vadd.f32 1e-05, %v299_v48  ;;  %v300_v55 = vsub.f32 %v288_v49, %v294_v42 }
 0x20c   :  { %v333_v56 = vmul.f32 %v706_v33, %v320_v51  ;;  %v351_v62 = vmax.f32 %v345_v57, 0.0 }
 0x20d   :  { %893 = vrsqrt.f32 %v311_v52  ;;  %v312_v58 = vadd.f32 1e-05, %v300_v55 }
 0x20e   :  { %v346_v60 = vadd.f32 %v707_v12, %v333_v56 }
 0x20f   :  { %v890_v61 = vpop.eup %889  ;;  %895 = vrsqrt.f32 %v312_v58 }
 0x210   :  { %v352_v63 = vmax.f32 %v346_v60, 0.0  ;;  %v321_v1 = vmul.f32 %v890_v61, %v303_v59 }
 0x211   :  { %v892_v2 = vpop.eup %891 }
 0x212   :  { %v357_v3 = vpack.c.bf16 %v352_v63, %v351_v62  ;;  %v322_v4 = vmul.f32 %v892_v2, %v304_v15  ;;  %v334_v5 = vmul.f32 %v706_v33, %v321_v1 }
 0x214   :  { %570 = vmatmul.mubr.bf16.vlgmr.msra.gmra.mrb[0].mxu1 %v357_v3  ;;  %799 = vmatmul.mubr.bf16.vlgmr.msra.gmra.mrb[12].mxu0 %v357_v3  ;;  %v335_v7 = vmul.f32 %v706_v33, %v322_v4  ;;  %v347_v8 = vadd.f32 %v707_v12, %v334_v5 }
 0x215   :  { %818 = vmatpush3.bf16.msra.mxu1 %v1235_v26  ;;  %579 = vmatprep.mubr.bf16.mxu1 %v1073_v54 }
 0x216   :  { %811 = vmatprep.subr.bf16.mxu1 %v1071_v0  ;;  %v348_v21 = vadd.f32 %v707_v12, %v335_v7  ;;  %v353_v10 = vmax.f32 %v347_v8, 0.0 }
 0x217   :  { %v894_v6 = vpop.eup %893 }
 0x218   :  { %v354_v11 = vmax.f32 %v348_v21, 0.0  ;;  %v323_v13 = vmul.f32 %v894_v6, %v305_v18 }
 0x219   :  { %v896_v14 = vpop.eup %895  ;;  %819 = vmatpush3.bf16.msra.mxu1 %v1249_v35 }
 0x21a   :  { %812 = vmatprep.subr.bf16.mxu1 %v1071_v0  ;;  %v358_v16 = vpack.c.bf16 %v354_v11, %v353_v10  ;;  %v324_v26 = vmul.f32 %v896_v14, %v306_v9  ;;  %v336_v17 = vmul.f32 %v706_v33, %v323_v13 }
 0x21c   :  { %580 = vmatmul.mubr.bf16.gmra.mrb[4].mxu1 %v358_v16  ;;  %v337_v19 = vmul.f32 %v706_v33, %v324_v26  ;;  %v349_v27 = vadd.f32 %v707_v12, %v336_v17 }
 0x21d   :  { %820 = vmatpush3.bf16.msra.mxu1 %v1253_v38  ;;  %589 = vmatprep.mubr.bf16.mxu1 %v1073_v54  ;;  %v394_v38 = vlaneseq }
 0x21e   :  { %813 = vmatprep.subr.bf16.mxu1 %v1071_v0  ;;  %v350_v31 = vadd.f32 %v707_v12, %v337_v19  ;;  %v355_v20 = vmax.f32 %v349_v27, 0.0 }
 0x220   :  { %v356_v22 = vmax.f32 %v350_v31, 0.0 }
 0x221   :  { %821 = vmatpush3.bf16.msra.mxu1 %v1257_v41  ;;  %v395_v41 = vshrl.u32 %v394_v38, 7 }
 0x222   :  { %814 = vmatprep.subr.bf16.mxu1 %v1071_v0  ;;  %v359_v35 = vpack.c.bf16 %v356_v22, %v355_v20 }
 0x223   :  { %v404_v54 = vsub.s32 2, %v395_v41  ;;  %v400_v24 = vsub.s32 1, %v395_v41 }
 0x224   :  { %590 = vmatmul.mubr.bf16.gmra.mrb[8].mxu1 %v359_v35 }
 0x225   :  { %822 = vmatpush3.bf16.msra.mxu1 %v1261_v44  ;;  %802 = vmatprep.mubr.msk.bf16.mxu1 %vm1072_vm0, %v1071_v0  ;;  %v396_v44 = vsub.s32 0, %v395_v41  ;;  %v405_v25 = vrot.slane %v392_v23, %v404_v54  ;;  %v401_v28 = vrot.slane %v392_v23, %v400_v24 }
 0x226   :  { %815 = vmatprep.subr.bf16.mxu1 %v1071_v0 }
 0x229   :  { %823 = vmatpush3.bf16.msra.mxu1 %v1265_v47  ;;  %v397_v47 = vrot.slane %v392_v23, %v396_v44 }
 0x22a   :  { %816 = vmatprep.subr.bf16.mxu1 %v1071_v0 }
 0x22d   :  { %824 = vmatpush3.bf16.msra.mxu1 %v1269_v50 }
 0x22e   :  { %817 = vmatprep.subr.bf16.mxu1 %v1071_v0 }
 0x231   :  { %825 = vmatpush3.bf16.msra.mxu1 %v1273_v53 }
 0x234   :  { %803 = vmatmul.mubr.bf16.vlgmr.msra.gmra.mrb[12].mxu1 %v358_v16 }
 0x235   :  { %806 = vmatprep.mubr.msk.bf16.mxu1 %vm1072_vm0, %v1071_v0 }
 0x23c   :  { %807 = vmatmul.mubr.bf16.gmra.mrb[16].mxu1 %v359_v35 }
 0x2e7   :  { %v571_v29 = vpop.f32.mrb[0].mxu1  ;;  %v634_v50 = vpop.f32.mrb[12].mxu0 }
 0x2e8   :  { %v572_v30 = vadd.f32 %v571_v29, %v397_v47  ;;  %v635_v32 = vadd.f32 %v634_v50, %v405_v25  ;;  %v573_v33 = vpop.f32.mrb[1].mxu1  ;;  %v800_v53 = vpop.f32.mrb[13].mxu0 }
 0x2e9   :  { %v574_v34 = vadd.f32 %v573_v33, %v401_v28  ;;  %v575_v36 = vpop.f32.mrb[2].mxu1  ;;  %v637_v37 = vpop.f32.mrb[14].mxu0 }
 0x2ea   :  { %657 = vst [vmem:[#allocation13] sm:$0xff] %v572_v30  ;;  %659 = vst [vmem:[#allocation13 + $0x10] sm:$0xff] %v635_v32  ;;  %v576_v0 = vadd.f32 %v575_v36, %v397_v47  ;;  %v638_v39 = vadd.f32 %v637_v37, %v405_v25  ;;  %v577_v40 = vpop.f32.mrb[3].mxu1  ;;  %v801_v42 = vpop.f32.mrb[15].mxu0 }
 0x2eb   :  { %658 = vst [vmem:[#allocation13 + $0x8] sm:$0xff] %v574_v34  ;;  %v578_v43 = vadd.f32 %v577_v40, %v401_v28 }
 0x2ec   :  { %660 = vst [vmem:[#allocation13 + $0x18] sm:$0xff] %v576_v0  ;;  %662 = vst [vmem:[#allocation13 + $0x28] sm:$0xff] %v638_v39 }
 0x2ed   :  { %661 = vst [vmem:[#allocation13 + $0x20] sm:$0xff] %v578_v43 }
 0x2ef   :  { %v581_v45 = vpop.f32.mrb[4].mxu1 }
 0x2f0   :  { %v582_v46 = vadd.f32 %v581_v45, %v397_v47  ;;  %v583_v48 = vpop.f32.mrb[5].mxu1 }
 0x2f1   :  { %v584_v49 = vadd.f32 %v583_v48, %v401_v28  ;;  %v585_v12 = vpop.f32.mrb[6].mxu1 }
 0x2f2   :  { %663 = vst [vmem:[#allocation13 + $0x30] sm:$0xff] %v582_v46  ;;  %v586_v51 = vadd.f32 %v585_v12, %v397_v47  ;;  %v587_v52 = vpop.f32.mrb[7].mxu1 }
 0x2f3   :  { %664 = vst [vmem:[#allocation13 + $0x38] sm:$0xff] %v584_v49  ;;  %v588_v55 = vadd.f32 %v587_v52, %v401_v28 }
 0x2f4   :  { %666 = vst [vmem:[#allocation13 + $0x48] sm:$0xff] %v586_v51 }
 0x2f5   :  { %667 = vst [vmem:[#allocation13 + $0x50] sm:$0xff] %v588_v55 }
 0x2f7   :  { %v591_v56 = vpop.f32.mrb[8].mxu1 }
 0x2f8   :  { %v592_v57 = vadd.f32 %v591_v56, %v397_v47  ;;  %v593_v58 = vpop.f32.mrb[9].mxu1 }
 0x2f9   :  { %v594_v59 = vadd.f32 %v593_v58, %v401_v28  ;;  %v595_v60 = vpop.f32.mrb[10].mxu1 }
 0x2fa   :  { %669 = vst [vmem:[#allocation13 + $0x60] sm:$0xff] %v592_v57  ;;  %v596_v61 = vadd.f32 %v595_v60, %v397_v47  ;;  %v597_v15 = vpop.f32.mrb[11].mxu1 }
 0x2fb   :  { %670 = vst [vmem:[#allocation13 + $0x68] sm:$0xff] %v594_v59  ;;  %v598_v62 = vadd.f32 %v597_v15, %v401_v28 }
 0x2fc   :  { %672 = vst [vmem:[#allocation13 + $0x78] sm:$0xff] %v596_v61 }
 0x2fd   :  { %673 = vst [vmem:[#allocation13 + $0x80] sm:$0xff] %v598_v62 }
 0x307   :  { %v642_v63 = vpop.f32.mrb[12].mxu1 }
 0x308   :  { %v643_v1 = vadd.f32 %v642_v63, %v405_v25  ;;  %v804_v2 = vpop.f32.mrb[13].mxu1 }
 0x309   :  { %v645_v3 = vpop.f32.mrb[14].mxu1 }
 0x30a   :  { %665 = vst [vmem:[#allocation13 + $0x40] sm:$0xff] %v643_v1  ;;  %v646_v4 = vadd.f32 %v645_v3, %v405_v25  ;;  %v805_v5 = vpop.f32.mrb[15].mxu1 }
 0x30c   :  { %668 = vst [vmem:[#allocation13 + $0x58] sm:$0xff] %v646_v4 }
 0x30f   :  { %v650_v7 = vpop.f32.mrb[16].mxu1 }
 0x310   :  { %v651_v8 = vadd.f32 %v650_v7, %v405_v25  ;;  %v808_v18 = vpop.f32.mrb[17].mxu1 }
 0x311   :  { %v653_v21 = vpop.f32.mrb[18].mxu1 }
 0x312   :  { %671 = vst [vmem:[#allocation13 + $0x70] sm:$0xff] %v651_v8  ;;  %v654_v6 = vadd.f32 %v653_v21, %v405_v25  ;;  %v809_v9 = vpop.f32.mrb[19].mxu1 }
 0x314   :  { %674 = vst [vmem:[#allocation13 + $0x88] sm:$0xff] %v654_v6 }
 0x315   :  { %1040 = shalt.err (!%p1037_p10)
}
 0x316   :  { %s1041_s23 = scalar_lea.hbm %s1323_s6, 2304 }
 0x317   :  { %p1042_p11 = scmp.ne.s32.totalorder %s1323_s6, %s1041_s23  ;;  %p1045_p12 = scmp.lt.u32.totalorder %s1041_s23, %s1323_s6 }
 0x319   :  { %p1047_p13 = pnand %p1045_p12, %p1042_p11 }
 0x31b   :  { %1050 = shalt.err (!%p1047_p13)
}
 0x31c   :  { %s1075_s30 = smov 384   ;;  %s1076_s7 = smov 24  }
 0x31d   :  { %686 = dma.vmem_to_hbm [thread:$0]  %s681_s0, 2304, %s1323_s6, [#allocation4], %s1075_s30, %s1075_s30, %s1076_s7  }
 0x31e   :  { %1059 = dma.done.wait [#allocation4], 2304  }
 0x31f   :  { %1060 = vsyncadd [#allocation4], 4294964992 }
 0x320   :  { %690 = vsyncpa [#allocation3], 1 }
 0x321   :  { %691 = vsyncpa [#allocation6], 1 }
 0x322   :  { %692 = vsyncpa [#allocation9], 1 }
 0x323   :  { %693 = vsyncpa [#allocation12], 1 }
 0x324   :  { %694 = vsyncpa [#allocation4], 1 }

</bundles_post_ra>
